<compile_context>
chip_gen: v7x
topology: tpu7x:2x2x1
jax: 0.10.0
libtpu: 0.0.40
codegen_flags: <defaults>
</compile_context>

<pallas_src>
import functools

import jax
import jax.numpy as jnp
from jax.experimental import pallas as pl
from jax.experimental.pallas import tpu as pltpu


def _leaky_relu_kernel(x_ref, o_ref, *, a: float):
    x = x_ref[...]
    o_ref[...] = jnp.where(x >= 0, x, x * a)


def _round_up(x: int, m: int) -> int:
    return ((x + m - 1) // m) * m


@functools.lru_cache(maxsize=1)
def _tpu_generation() -> int:
    """Best-effort TPU generation from device_kind; 0 if unknown (conservative)."""
    try:
        kind = jax.devices()[0].device_kind.lower()
    except Exception:
        return 0
    for g in (7, 6, 5, 4):
        if f"v{g}" in kind or f"{g}e" in kind or f"{g}x" in kind or f"{g}p" in kind:
            return g
    return 0


def _tuning():
    """Returns (target_block_bytes, num_tensorcores, vmem_limit_bytes_or_None)."""
    gen = _tpu_generation()
    if gen >= 7:
        # v7x: ~3.2 TB/s HBM -> bigger blocks to amortize the ~0.35us/step cost,
        # but only 64 MiB physical VMEM -> cap scoped VMEM at 48 MiB.
        return 8 * 1024 * 1024, 2, 48 * 1024 * 1024
    if gen == 6:
        # v6e: 4 MiB blocks (~16 MiB double-buffered in+out) fit the 32 MiB default.
        return 4 * 1024 * 1024, 1, None
    # v5e / unknown: default scoped VMEM is 16 MiB -> keep 2 MiB blocks, no flag.
    return 2 * 1024 * 1024, 1, None


def leaky_relu(x: jax.Array, a: float = 0.01) -> jax.Array:
    """LeakyReLU: y = x if x >= 0 else a * x. Preserves shape & dtype."""
    orig_shape = x.shape
    size = int(x.size)
    if size == 0:
        return x
    a = float(a)  # weak type: no accidental upcast of bf16 inputs

    # ---- lane-dense column count that *divides* the flat size (no pad/slice) ----
    cols = 0
    for c in (2048, 1024, 512, 384, 256, 128):
        if size % c == 0:
            cols = c
            break

    if cols == 0:
        # Rare ragged case (size not a multiple of 128): run the kernel on the
        # 128-divisible bulk, compute the tiny tail with plain jnp.where.
        flat = x.reshape(-1)
        bulk = (size // 128) * 128
        if bulk == 0:
            return jnp.where(x >= 0, x, x * a)
        head = leaky_relu(flat[:bulk], a)          # bulk is a multiple of 128
        tail = flat[bulk:]
        tail = jnp.where(tail >= 0, tail, tail * a)
        return jnp.concatenate([head, tail]).reshape(orig_shape)

    rows = size // cols
    x2d = x.reshape(rows, cols)  # contiguous reshape: no data movement

    # ---- generation-tuned tile size + megacore balancing ----
    itemsize = x.dtype.itemsize
    target_block_bytes, num_tc, vmem_limit = _tuning()
    # sublane-packing multiple per dtype (f32: 8, bf16: 16, int8/fp8: 32)
    sub = max(8, 32 // max(1, itemsize))
    max_tr = max(sub, (target_block_bytes // (cols * itemsize)) // sub * sub)

    if rows <= max_tr:
        if num_tc > 1 and rows > sub:
            # Split even single-block work across the two TensorCores.
            tr = _round_up(pl.cdiv(rows, 2), sub)
        else:
            tr = rows  # single full-extent block (legal for any row count)
    else:
        n_steps = pl.cdiv(rows, max_tr)
        if num_tc > 1 and n_steps % 2 == 1:
            n_steps += 1  # even step count -> balanced across both TCs
        tr = _round_up(pl.cdiv(rows, n_steps), sub)
    grid = (pl.cdiv(rows, tr),)

    cp_kwargs = dict(dimension_semantics=("parallel",))
    if vmem_limit is not None:
        cp_kwargs["vmem_limit_bytes"] = vmem_limit

    out2d = pl.pallas_call(
        functools.partial(_leaky_relu_kernel, a=a),
        out_shape=jax.ShapeDtypeStruct((rows, cols), x.dtype),
        grid=grid,
        in_specs=[pl.BlockSpec((tr, cols), lambda i: (i, 0))],
        out_specs=pl.BlockSpec((tr, cols), lambda i: (i, 0)),
        compiler_params=pltpu.CompilerParams(**cp_kwargs),
        cost_estimate=pl.CostEstimate(
            flops=size, transcendentals=0, bytes_accessed=2 * size * itemsize
        ),
    )(x2d)

    return out2d.reshape(orig_shape)


if __name__ == "__main__":
    key = jax.random.PRNGKey(0)

    # NCHW input, as the PyTorch module would see it. size=2048 -> divisor path.
    x = jax.random.normal(key, (2, 4, 16, 16), dtype=jnp.float32)
    y = jax.block_until_ready(leaky_relu(x, a=0.01))
    y_ref = jnp.where(x >= 0, x, 0.01 * x)
    assert y.shape == x.shape and y.dtype == x.dtype
    assert jnp.allclose(y, y_ref, atol=1e-6, rtol=1e-6)

    # Odd-sized input (3315 elements): exercises the 128-indivisible bulk+tail path.
    x2 = jax.random.normal(jax.random.PRNGKey(1), (3, 5, 17, 13), dtype=jnp.float32)
    y2 = jax.block_until_ready(leaky_relu(x2, a=0.01))
    y2_ref = jnp.where(x2 >= 0, x2, 0.01 * x2)
    assert y2.shape == x2.shape and y2.dtype == x2.dtype
    assert jnp.allclose(y2, y2_ref, atol=1e-6, rtol=1e-6)

    # bf16 input: exercises the dtype-scaled tiling path.
    x3 = jax.random.normal(jax.random.PRNGKey(2), (2, 8, 16, 16), dtype=jnp.bfloat16)
    y3 = jax.block_until_ready(leaky_relu(x3, a=0.01))
    y3_ref = jnp.where(x3 >= 0, x3, x3 * 0.01)
    assert y3.shape == x3.shape and y3.dtype == x3.dtype
    assert jnp.allclose(
        y3.astype(jnp.float32), y3_ref.astype(jnp.float32), atol=1e-2, rtol=1e-2
    )

    print("KERNEL_OK")
</pallas_src>

<mosaic_0001>
module attributes {stable_mosaic.version = 11 : i64} {
  func.func @_leaky_relu_kernel(%arg0: i32, %arg1: memref<1x2048xf32, #tpu.memory_space<vmem>>, %arg2: memref<1x2048xf32, #tpu.memory_space<vmem>>) attributes {dimension_semantics = [#tpu.dimension_semantics<parallel>], iteration_bounds = array<i64: 1>, scalar_prefetch = 0 : i64, scratch_operands = 0 : i64, tpu.core_type = #tpu.core_type<tc>, window_params = [{transform_indices = @transform_0, window_bounds = array<i64: 1, 2048>}, {transform_indices = @transform_1, window_bounds = array<i64: 1, 2048>}]} {
    %c0 = arith.constant 0 : index
    %c0_0 = arith.constant 0 : index
    %0 = vector.load %arg1[%c0, %c0_0] : memref<1x2048xf32, #tpu.memory_space<vmem>>, vector<1x2048xf32>
    %cst = arith.constant 0.000000e+00 : f32
    %1 = vector.broadcast %cst : f32 to vector<1x2048xf32>
    %2 = arith.cmpf oge, %0, %1 : vector<1x2048xf32>
    %cst_1 = arith.constant 0.00999999977 : f32
    %3 = vector.broadcast %cst_1 : f32 to vector<1x2048xf32>
    %4 = arith.mulf %0, %3 : vector<1x2048xf32>
    %5 = arith.select %2, %0, %4 : vector<1x2048xi1>, vector<1x2048xf32>
    %c0_2 = arith.constant 0 : index
    %c0_3 = arith.constant 0 : index
    %6 = vector.load %arg2[%c0_2, %c0_3] : memref<1x2048xf32, #tpu.memory_space<vmem>>, vector<1x2048xf32>
    tpu.vector_store %arg2[%c0_2, %c0_3], %5 {strides = array<i32>} : memref<1x2048xf32, #tpu.memory_space<vmem>>, vector<1x2048xf32>,
    return
  }
  func.func @transform_0(%arg0: i32) -> (i32, i32) {
    %c0_i32 = arith.constant 0 : i32
    %c0_i32_0 = arith.constant 0 : i32
    return %arg0, %c0_i32 : i32, i32
  }
  func.func @transform_1(%arg0: i32) -> (i32, i32) {
    %c0_i32 = arith.constant 0 : i32
    %c0_i32_0 = arith.constant 0 : i32
    return %arg0, %c0_i32 : i32, i32
  }
}

</mosaic_0001>

<bundles_post_ra>
// kernel: tpu_custom_call.1
= control target key start
LH: loop header
LB: loop body
LE: loop exit
PB: predicated region body
PF: predicated region fallthrough
CT: control target
= control target key end

     0   :  { %6 = vsyncpa [#allocation3], 0  ;;  %s132_s0 = inlined_call_operand.hbm [shape: f32[1,2048], index: 0, kind: input, shape index: {}]   ;;  %s133_s1 = inlined_call_operand.hbm [shape: f32[1,2048], index: 1, kind: output, shape index: {}]  }
   0x1   :  { %7 = vsyncpa [#allocation4], 0  ;;  %s96_s6 = smov [#allocation2]   ;;  %s48_s10 = scalar_lea.hbm %s132_s0, 256 }
   0x2   :  { %s14_s7 = sshll.u32 %s96_s6, 4  ;;  %p49_p0 = scmp.ne.s32.totalorder %s132_s0, %s48_s10  ;;  %s15_s7 = int_to_ptr.vmem [resolvable:$true] %s14_s7 }
   0x3   :  { %p52_p1 = scmp.lt.u32.totalorder %s48_s10, %s132_s0 }
   0x5   :  { %p54_p2 = pnand %p52_p1, %p49_p0 }
   0x7   :  { %57 = shalt.err (!%p54_p2)
}
   0x8   :  { %s58_s15 = scalar_lea.vmem %s15_s7, 256  ;;  %p63_p4 = scmp.lt.s32.totalorder %s15_s7, %s15_s7 }
   0x9   :  { %p59_p3 = scmp.ne.s32.totalorder %s15_s7, %s58_s15  ;;  %p64_p5 = scmp.lt.s32.totalorder %s58_s15, %s58_s15 }
   0xb   :  { %p65_p6 = por %p64_p5, %p63_p4 }
   0xd   :  { %p66_p7 = pnand %p65_p6, %p59_p3 }
   0xf   :  { %69 = shalt.err (!%p66_p7)
}
  0x10   :  { %17 = dma.hbm_to_vmem [thread:$0]  %s132_s0, 256, %s15_s7, [#allocation3]  }
  0x11   :  { %92 = dma.done.wait [#allocation3], 256  }
  0x12   :  { %93 = vsyncadd [#allocation3], 4294967040  ;;  %s97_s18 = smov [#allocation5]   ;;  %v21_v0 = vld [vmem:[#allocation2] sm:$0xff]  ;;  %v22_v1 = vld [vmem:[#allocation2 + $0x8] sm:$0xff] }
  0x13   :  { %s37_s19 = sshll.u32 %s97_s18, 4  ;;  %vm23_vm0 = vcmp.ge.f32.partialorder %v21_v0, 0.0  ;;  %v25_v2 = vmul.f32 0.01, %v21_v0  ;;  %vm24_vm1 = vcmp.ge.f32.partialorder %v22_v1, 0.0  ;;  %s38_s19 = int_to_ptr.vmem [resolvable:$true] %s37_s19 }
  0x14   :  { %v26_v3 = vmul.f32 0.01, %v22_v1  ;;  %s70_s20 = scalar_lea.vmem %s38_s19, 256  ;;  %p75_p9 = scmp.lt.s32.totalorder %s38_s19, %s38_s19 }
  0x15   :  { %v27_v4 = vsel %vm23_vm0, %v21_v0, %v25_v2  ;;  %p71_p8 = scmp.ne.s32.totalorder %s38_s19, %s70_s20  ;;  %p76_p10 = scmp.lt.s32.totalorder %s70_s20, %s70_s20 }
  0x16   :  { %v28_v5 = vsel %vm24_vm1, %v22_v1, %v26_v3  ;;  %29 = vst [vmem:[#allocation5] sm:$0xff] %v27_v4 }
  0x17   :  { %30 = vst [vmem:[#allocation5 + $0x8] sm:$0xff] %v28_v5  ;;  %p77_p11 = por %p76_p10, %p75_p9 }
  0x19   :  { %p78_p12 = pnand %p77_p11, %p71_p8 }
  0x1b   :  { %81 = shalt.err (!%p78_p12)
}
  0x1c   :  { %s82_s22 = scalar_lea.hbm %s133_s1, 256 }
  0x1d   :  { %p83_p13 = scmp.ne.s32.totalorder %s133_s1, %s82_s22  ;;  %p86_p0 = scmp.lt.u32.totalorder %s82_s22, %s133_s1 }
  0x1f   :  { %p88_p1 = pnand %p86_p0, %p83_p13 }
  0x21   :  { %91 = shalt.err (!%p88_p1)
}
  0x22   :  { %40 = dma.vmem_to_hbm [thread:$0]  %s38_s19, 256, %s133_s1, [#allocation4]  }
  0x23   :  { %94 = dma.done.wait [#allocation4], 256  }
  0x24   :  { %95 = vsyncadd [#allocation4], 4294967040 }
  0x25   :  { %44 = vsyncpa [#allocation3], 1 }
  0x26   :  { %45 = vsyncpa [#allocation4], 1 }

</bundles_post_ra>
